<compile_context>
chip_gen: v6e
topology: v6e:2x2x1
jax: 0.10.0
libtpu: 0.0.40
codegen_flags: <defaults>
</compile_context>

<pallas_src>
import jax
import jax.numpy as jnp
from jax.experimental import pallas as pl
from jax.experimental.pallas import tpu as pltpu


def _double_conv1x1_kernel(wb_ref, x_ref, o_ref):
    # wb_ref: SMEM (2,) = [w, b].  Fold conv(conv(x)) = w*(w*x+b)+b into one
    # affine pass.  Scalar math (a, c) rides the free scalar slots.
    w = wb_ref[0]
    b = wb_ref[1]
    a = w * w
    c = w * b + b
    o_ref[...] = x_ref[...] * a + c


def module_for_test_forward(x_nchw, conv_w, conv_b):
    """x_nchw: (N, 1, H, W) float32.  conv_w/conv_b: the 1x1 conv's weight and
    bias (any shape with a single element).  Returns conv(conv(x)), NCHW."""
    N, C, H, W = x_nchw.shape
    assert C == 1, "Conv2d(1, 1, 1) expects a single input channel"

    total = N * C * H * W
    # Lane-dense layout: make the last (lane) dim 128 when possible so stores
    # are unmasked full-vreg vst.  Fallback keeps W on the lane axis.
    if total % 128 == 0:
        rows, cols = total // 128, 128
    else:
        rows, cols = N * C * H, W
    x2d = x_nchw.reshape(rows, cols)

    # Single combined SMEM scalar array [w, b] (one small input instead of two).
    wb = jnp.stack([conv_w.reshape(()), conv_b.reshape(())]).astype(x2d.dtype)

    # Row tiling: a single full-array block at small sizes; bounded "parallel"
    # row tiles at large sizes (keeps the per-block VMEM footprint within
    # v5e/v7x scoped budgets and lets megacore shard the grid).
    tile_rows = rows if rows <= 1024 else 1024
    grid = (pl.cdiv(rows, tile_rows),)

    out2d = pl.pallas_call(
        _double_conv1x1_kernel,
        out_shape=jax.ShapeDtypeStruct((rows, cols), x2d.dtype),
        grid=grid,
        in_specs=[
            pl.BlockSpec(memory_space=pltpu.MemorySpace.SMEM),     # [w, b]
            pl.BlockSpec((tile_rows, cols), lambda i: (i, 0)),     # x tile
        ],
        out_specs=pl.BlockSpec((tile_rows, cols), lambda i: (i, 0)),
        # Elementwise and the flattened input is dead afterwards: alias it to
        # the output to avoid a second HBM buffer / writeback allocation.
        input_output_aliases={1: 0},
        compiler_params=pltpu.CompilerParams(
            dimension_semantics=("parallel",)),
    )(wb, x2d)

    return out2d.reshape(N, C, H, W)


if __name__ == "__main__":
    key = jax.random.PRNGKey(0)
    k_x, k_w, k_b = jax.random.split(key, 3)

    # Shapes consistent with Conv2d(1, 1, 1): N=2, C=1, H=W=16.
    x = jax.random.normal(k_x, (2, 1, 16, 16), dtype=jnp.float32)

    conv_weight = jax.random.normal(k_w, (1, 1, 1, 1), dtype=jnp.float32)
    conv_bias = jax.random.normal(k_b, (1,), dtype=jnp.float32)
    unused_weight = jnp.zeros((1, 2), dtype=jnp.float32)  # self.weight (unused)

    fwd = jax.jit(module_for_test_forward)
    out = fwd(x, conv_weight, conv_bias)
    out = jax.block_until_ready(out)

    # Reference: conv(conv(x)) = w*(w*x + b) + b   (plain JAX)
    w0 = conv_weight.reshape(())
    b0 = conv_bias.reshape(())
    ref = (x * w0 + b0) * w0 + b0

    assert out.shape == x.shape and out.dtype == x.dtype
    assert jnp.allclose(out, ref, atol=1e-5, rtol=1e-5)

    print("KERNEL_OK")
</pallas_src>

<mosaic_0001>
module attributes {stable_mosaic.version = 11 : i64} {
  func.func @_double_conv1x1_kernel(%arg0: i32, %arg1: memref<2xf32, #tpu.memory_space<smem>>, %arg2: memref<4x128xf32, #tpu.memory_space<vmem>>, %arg3: memref<4x128xf32, #tpu.memory_space<vmem>>) attributes {dimension_semantics = [#tpu.dimension_semantics<parallel>], iteration_bounds = array<i64: 1>, scalar_prefetch = 0 : i64, scratch_operands = 0 : i64, tpu.core_type = #tpu.core_type<tc>, window_params = [{transform_indices = @transform_0, window_bounds = array<i64: 2>}, {transform_indices = @transform_1, window_bounds = array<i64: 4, 128>}, {transform_indices = @transform_2, window_bounds = array<i64: 4, 128>}]} {
    %c0 = arith.constant 0 : index
    %0 = memref.load %arg1[%c0] : memref<2xf32, #tpu.memory_space<smem>>
    %c1 = arith.constant 1 : index
    %1 = memref.load %arg1[%c1] : memref<2xf32, #tpu.memory_space<smem>>
    %2 = arith.mulf %0, %0 : f32
    %3 = arith.mulf %0, %1 : f32
    %4 = arith.addf %3, %1 : f32
    %c0_0 = arith.constant 0 : index
    %c0_1 = arith.constant 0 : index
    %5 = vector.load %arg2[%c0_0, %c0_1] : memref<4x128xf32, #tpu.memory_space<vmem>>, vector<4x128xf32>
    %6 = vector.broadcast %2 : f32 to vector<4x128xf32>
    %7 = arith.mulf %5, %6 : vector<4x128xf32>
    %8 = vector.broadcast %4 : f32 to vector<4x128xf32>
    %9 = arith.addf %7, %8 : vector<4x128xf32>
    %c0_2 = arith.constant 0 : index
    %c0_3 = arith.constant 0 : index
    %10 = vector.load %arg3[%c0_2, %c0_3] : memref<4x128xf32, #tpu.memory_space<vmem>>, vector<4x128xf32>
    tpu.vector_store %arg3[%c0_2, %c0_3], %9 {strides = array<i32>} : memref<4x128xf32, #tpu.memory_space<vmem>>, vector<4x128xf32>,
    return
  }
  func.func @transform_0(%arg0: i32) -> i32 {
    %c0_i32 = arith.constant 0 : i32
    %c0_i32_0 = arith.constant 0 : i32
    return %c0_i32 : i32
  }
  func.func @transform_1(%arg0: i32) -> (i32, i32) {
    %c0_i32 = arith.constant 0 : i32
    %c0_i32_0 = arith.constant 0 : i32
    return %arg0, %c0_i32 : i32, i32
  }
  func.func @transform_2(%arg0: i32) -> (i32, i32) {
    %c0_i32 = arith.constant 0 : i32
    %c0_i32_0 = arith.constant 0 : i32
    return %arg0, %c0_i32 : i32, i32
  }
}

</mosaic_0001>

<bundles_post_ra>
// kernel: module_for_test_forward.1
= control target key start
LH: loop header
LB: loop body
LE: loop exit
PB: predicated region body
PF: predicated region fallthrough
CT: control target
= control target key end

     0   :  { %7 = vsyncpa [#allocation3], 0  ;;  %s81_s0 = inlined_call_operand.vmem [shape: f32[2], index: 0, kind: input, shape index: {}]   ;;  %s82_s1 = inlined_call_operand.vmem [shape: f32[4,128], index: 1, kind: input, shape index: {}, may-alias: {1,2}]   ;;  %s83_s2 = inlined_call_operand.vmem [shape: f32[4,128], index: 2, kind: output, shape index: {}, may-alias: {1,2}]  }
   0x1   :  { %s14_s11 = sshll.u32 %s81_s0, 4  ;;  %s15_s11 = int_to_ptr.vmem [resolvable:$true] %s14_s11 }
   0x2   :  { %s42_s12 = scalar_lea.vmem %s15_s11, 16  ;;  %p47_p1 = scmp.lt.s32.totalorder %s15_s11, %s15_s11 }
   0x3   :  { %p43_p0 = scmp.ne.s32.totalorder %s15_s11, %s42_s12  ;;  %p48_p2 = scmp.lt.s32.totalorder %s42_s12, %s42_s12 }
   0x5   :  { %p49_p3 = por %p48_p2, %p47_p1 }
   0x7   :  { %p50_p4 = pnand %p49_p3, %p43_p0 }
   0x9   :  { %53 = shalt.err (!%p50_p4)
}
   0xa   :  { %s56_s13 = smov [#allocation2]  }
   0xb   :  { %17 = dma.vmem_to_smem %s15_s11, 16, %s56_s13, [#allocation3]  }
   0xc   :  { %54 = dma.done.wait [#allocation3], 16  }
   0xd   :  { %55 = vsyncadd [#allocation3], 4294967280 }
   0xe   :  { %23 = sfence }
   0xf   :  { %s24_s14 = sld [smem:[#allocation2]]  ;;  %v29_v0 = vld [vmem:[%s82_s1] sm:$0xf] }
  0x10   :  { %s40_s15 = sld [smem:[#allocation2 + $0x1]] }
  0x15   :  { %s26_s16 = smul.f32 %s24_s14, %s24_s14 }
  0x16   :  { %s27_s0 = smul.f32 %s40_s15, %s24_s14 }
  0x17   :  { %v30_v1 = vstv %s26_s16 }
  0x18   :  { %s28_s19 = sadd.f32 %s40_s15, %s27_s0  ;;  %v31_v2 = vmul.f32 %v30_v1, %v29_v0 }
  0x1a   :  { %v32_v3 = vstv %s28_s19 }
  0x1b   :  { %v33_v4 = vadd.f32 %v32_v3, %v31_v2 }
  0x1d   :  { %34 = vst [vmem:[%s83_s2] sm:$0xf] %v33_v4 }
  0x1e   :  { %39 = vsyncpa [#allocation3], 1 }

</bundles_post_ra>
